<compile_context>
chip_gen: v6e
topology: v6e:2x2x1
jax: 0.10.0
libtpu: 0.0.40
codegen_flags: <defaults>
</compile_context>

<pallas_src>
import functools

import jax
import jax.numpy as jnp
from jax.experimental import pallas as pl
from jax.experimental.pallas import tpu as pltpu


def _round_up(x: int, m: int) -> int:
    return ((x + m - 1) // m) * m


def _pad_2d(a, rows: int, cols: int):
    """Zero-pad a 2-D array up to (rows, cols)."""
    out = jnp.zeros((rows, cols), a.dtype)
    return out.at[: a.shape[0], : a.shape[1]].set(a)


def _decoder_mlp_kernel(sig_ref, lat_ref, w1s_ref, w1l_ref, w2_ref, w3_ref,
                        b_ref, o_ref, *, hidden_p, out_p):
    """Fused concat + 3-layer MLP on one batch tile (everything in VMEM)."""
    sig = sig_ref[...]
    lat = lat_ref[...]
    # Layer 1 (concat fused):  [sig, lat] @ [[W1_sig], [W1_lat]] + b1, ReLU
    h1 = jnp.dot(sig, w1s_ref[...], preferred_element_type=jnp.float32)
    h1 = h1 + jnp.dot(lat, w1l_ref[...], preferred_element_type=jnp.float32)
    h1 = jnp.maximum(h1 + b_ref[0:1, :hidden_p], 0.0)
    # Layer 2: Linear + ReLU
    h2 = jnp.dot(h1, w2_ref[...], preferred_element_type=jnp.float32)
    h2 = jnp.maximum(h2 + b_ref[1:2, :hidden_p], 0.0)
    # Layer 3: Linear (lane-dense padded output; wrapper slices real columns)
    out = jnp.dot(h2, w3_ref[...], preferred_element_type=jnp.float32)
    o_ref[...] = (out + b_ref[2:3, :out_p]).astype(o_ref.dtype)


def decoder_mlp_pallas(signal, latent, kparams, out_dim):
    """signal: [B, S], latent: [B, L]; kparams hold padded/split kernel weights."""
    w1s, w1l, w2, w3, b = (kparams["w1_sig"], kparams["w1_lat"],
                           kparams["w2"], kparams["w3"], kparams["b"])
    B, S = signal.shape
    L = latent.shape[1]
    Hp = w2.shape[0]     # padded hidden width (multiple of 128)
    Op = w3.shape[1]     # padded output width (multiple of 128)
    BW = b.shape[1]

    # Row tile: full batch when small (full-dim escape of the (8,128) rule),
    # otherwise 512-row tiles (multiple of 8 sublanes; partial last tile OK
    # since rows are independent and OOB rows are simply not written back).
    TB = B if B <= 512 else 512
    grid = (pl.cdiv(B, TB),)

    def row_spec(d):
        return pl.BlockSpec((TB, d), lambda i: (i, 0))

    def pinned_spec(r, c):
        # Constant index_map -> block stays resident in VMEM across grid steps.
        return pl.BlockSpec((r, c), lambda i: (0, 0))

    flops = 2 * B * (S * Hp + L * Hp + Hp * Hp + Hp * Op)
    bytes_accessed = 4 * (B * (S + L + Op) + (S + L) * Hp
                          + Hp * Hp + Hp * Op + 3 * BW)

    # TODO(synk): for larger hidden dims, cast matmul inputs to bf16 (keep
    # preferred_element_type=f32) to use the fast MXU mode on v5e/v6e/v7x.
    out_padded = pl.pallas_call(
        functools.partial(_decoder_mlp_kernel, hidden_p=Hp, out_p=Op),
        out_shape=jax.ShapeDtypeStruct((B, Op), jnp.float32),
        grid=grid,
        in_specs=[
            row_spec(S),            # signal tile
            row_spec(L),            # latent tile
            pinned_spec(S, Hp),     # W1_sig
            pinned_spec(L, Hp),     # W1_lat
            pinned_spec(Hp, Hp),    # W2
            pinned_spec(Hp, Op),    # W3
            pinned_spec(3, BW),     # packed biases [b1; b2; b3]
        ],
        out_specs=row_spec(Op),
        compiler_params=pltpu.CompilerParams(
            dimension_semantics=("parallel",)),
        cost_estimate=pl.CostEstimate(flops=flops, transcendentals=0,
                                      bytes_accessed=bytes_accessed),
    )(signal, latent, w1s, w1l, w2, w3, b)

    return out_padded[:, :out_dim]


class DecoderNetworkPallas:
    """JAX/Pallas port of polaris.networks.mlp.DecoderNetwork (forward only)."""

    def __init__(self, action_dim, latent_dim, hidden_dim, num_agents,
                 num_belief_states, key):
        self.action_dim = action_dim
        self.num_agents = num_agents
        self.num_belief_states = num_belief_states
        self.latent_dim = latent_dim
        input_dim = num_belief_states + latent_dim
        output_dim = action_dim * num_agents
        self.out_dim = output_dim

        # --- torch-equivalent (unpadded) parameters, [in, out] layout ---
        dims = [input_dim, hidden_dim, hidden_dim, output_dim]
        keys = jax.random.split(key, 2 * (len(dims) - 1))
        params = {}
        for i in range(len(dims) - 1):
            fan_in, fan_out = dims[i], dims[i + 1]
            bound = 1.0 / float(fan_in) ** 0.5  # torch nn.Linear default init
            params[f"w{i+1}"] = jax.random.uniform(
                keys[2 * i], (fan_in, fan_out), jnp.float32, -bound, bound)
            params[f"b{i+1}"] = jax.random.uniform(
                keys[2 * i + 1], (1, fan_out), jnp.float32, -bound, bound)
        self.params = params

        # --- kernel-layout parameters: W1 split at the concat boundary,
        # hidden/output widths zero-padded to 128-lane multiples, biases
        # packed into a single (3, BW) array.  Zero padding is exact: padded
        # hidden units get relu(0)=0 and padded W2/W3 rows/cols are zero. ---
        Hp = _round_up(hidden_dim, 128)
        Op = _round_up(output_dim, 128)
        BW = max(Hp, Op)
        self.kparams = {
            "w1_sig": _pad_2d(params["w1"][:num_belief_states],
                              num_belief_states, Hp),
            "w1_lat": _pad_2d(params["w1"][num_belief_states:],
                              latent_dim, Hp),
            "w2": _pad_2d(params["w2"], Hp, Hp),
            "w3": _pad_2d(params["w3"], Hp, Op),
            "b": jnp.concatenate([_pad_2d(params["b1"], 1, BW),
                                  _pad_2d(params["b2"], 1, BW),
                                  _pad_2d(params["b3"], 1, BW)], axis=0),
        }

    def __call__(self, signal, latent):
        signal = jnp.asarray(signal, jnp.float32)
        latent = jnp.asarray(latent, jnp.float32)
        if latent.ndim == 3:
            latent = jnp.squeeze(latent, axis=0)
        if signal.ndim == 1:
            signal = signal[None, :]
        if latent.ndim == 1:
            latent = latent[None, :]
        # No jnp.concatenate here: the concat is fused into the kernel.
        return decoder_mlp_pallas(signal, latent, self.kparams, self.out_dim)


def _reference_forward(signal, latent, params):
    """Pure-JAX reference for correctness checking (unpadded params)."""
    x = jnp.concatenate([signal, latent], axis=1)
    h1 = jnp.maximum(x @ params["w1"] + params["b1"], 0.0)
    h2 = jnp.maximum(h1 @ params["w2"] + params["b2"], 0.0)
    return h2 @ params["w3"] + params["b3"]


if __name__ == "__main__":
    key = jax.random.PRNGKey(0)
    k_model, k_sig, k_lat = jax.random.split(key, 3)

    # Small shapes consistent with the module.
    batch = 2
    action_dim = 4
    latent_dim = 16
    hidden_dim = 32
    num_agents = 2
    num_belief_states = 16

    model = DecoderNetworkPallas(action_dim, latent_dim, hidden_dim,
                                 num_agents, num_belief_states, k_model)

    signal = jax.random.normal(k_sig, (batch, num_belief_states), jnp.float32)
    latent = jax.random.normal(k_lat, (batch, latent_dim), jnp.float32)

    out = model(signal, latent)
    out = jax.block_until_ready(out)

    assert out.shape == (batch, action_dim * num_agents), out.shape

    ref = _reference_forward(signal, latent, model.params)
    assert jnp.allclose(out, ref, atol=1e-4, rtol=1e-4), "mismatch vs reference"

    print("KERNEL_OK")
</pallas_src>

<mosaic_0001>
module attributes {stable_mosaic.version = 11 : i64} {
  func.func @_decoder_mlp_kernel(%arg0: i32, %arg1: memref<2x16xf32, #tpu.memory_space<vmem>>, %arg2: memref<2x16xf32, #tpu.memory_space<vmem>>, %arg3: memref<16x128xf32, #tpu.memory_space<vmem>>, %arg4: memref<16x128xf32, #tpu.memory_space<vmem>>, %arg5: memref<128x128xf32, #tpu.memory_space<vmem>>, %arg6: memref<128x128xf32, #tpu.memory_space<vmem>>, %arg7: memref<3x128xf32, #tpu.memory_space<vmem>>, %arg8: memref<2x128xf32, #tpu.memory_space<vmem>>) attributes {dimension_semantics = [#tpu.dimension_semantics<parallel>], iteration_bounds = array<i64: 1>, scalar_prefetch = 0 : i64, scratch_operands = 0 : i64, tpu.core_type = #tpu.core_type<tc>, window_params = [{transform_indices = @transform_0, window_bounds = array<i64: 2, 16>}, {transform_indices = @transform_1, window_bounds = array<i64: 2, 16>}, {pipeline_mode = #tpu.pipeline_mode<synchronous>, transform_indices = @transform_2, window_bounds = array<i64: 16, 128>}, {pipeline_mode = #tpu.pipeline_mode<synchronous>, transform_indices = @transform_3, window_bounds = array<i64: 16, 128>}, {pipeline_mode = #tpu.pipeline_mode<synchronous>, transform_indices = @transform_4, window_bounds = array<i64: 128, 128>}, {pipeline_mode = #tpu.pipeline_mode<synchronous>, transform_indices = @transform_5, window_bounds = array<i64: 128, 128>}, {pipeline_mode = #tpu.pipeline_mode<synchronous>, transform_indices = @transform_6, window_bounds = array<i64: 3, 128>}, {transform_indices = @transform_7, window_bounds = array<i64: 2, 128>}]} {
    %c0 = arith.constant 0 : index
    %c0_0 = arith.constant 0 : index
    %0 = vector.load %arg1[%c0, %c0_0] : memref<2x16xf32, #tpu.memory_space<vmem>>, vector<2x16xf32>
    %c0_1 = arith.constant 0 : index
    %c0_2 = arith.constant 0 : index
    %1 = vector.load %arg2[%c0_1, %c0_2] : memref<2x16xf32, #tpu.memory_space<vmem>>, vector<2x16xf32>
    %c0_3 = arith.constant 0 : index
    %c0_4 = arith.constant 0 : index
    %2 = vector.load %arg3[%c0_3, %c0_4] : memref<16x128xf32, #tpu.memory_space<vmem>>, vector<16x128xf32>
    %cst = arith.constant dense<0.000000e+00> : vector<2x128xf32>
    %3 = tpu.matmul %0, %2, %cst {dimension_numbers = #tpu.dot_dimension_numbers<[1], [0], [0], [1], [0, 0, 1, 1], [], []>} : vector<2x16xf32>, vector<16x128xf32>, vector<2x128xf32> -> vector<2x128xf32>
    %c0_5 = arith.constant 0 : index
    %c0_6 = arith.constant 0 : index
    %4 = vector.load %arg4[%c0_5, %c0_6] : memref<16x128xf32, #tpu.memory_space<vmem>>, vector<16x128xf32>
    %cst_7 = arith.constant dense<0.000000e+00> : vector<2x128xf32>
    %5 = tpu.matmul %1, %4, %cst_7 {dimension_numbers = #tpu.dot_dimension_numbers<[1], [0], [0], [1], [0, 0, 1, 1], [], []>} : vector<2x16xf32>, vector<16x128xf32>, vector<2x128xf32> -> vector<2x128xf32>
    %6 = arith.addf %3, %5 : vector<2x128xf32>
    %c0_8 = arith.constant 0 : index
    %c0_9 = arith.constant 0 : index
    %7 = vector.load %arg7[%c0_8, %c0_9] : memref<3x128xf32, #tpu.memory_space<vmem>>, vector<1x128xf32>
    %8 = vector.broadcast %7 : vector<1x128xf32> to vector<2x128xf32>
    %9 = arith.addf %6, %8 : vector<2x128xf32>
    %cst_10 = arith.constant 0.000000e+00 : f32
    %10 = vector.broadcast %cst_10 : f32 to vector<2x128xf32>
    %11 = arith.maximumf %9, %10 : vector<2x128xf32>
    %c0_11 = arith.constant 0 : index
    %c0_12 = arith.constant 0 : index
    %12 = vector.load %arg5[%c0_11, %c0_12] : memref<128x128xf32, #tpu.memory_space<vmem>>, vector<128x128xf32>
    %cst_13 = arith.constant dense<0.000000e+00> : vector<2x128xf32>
    %13 = tpu.matmul %11, %12, %cst_13 {dimension_numbers = #tpu.dot_dimension_numbers<[1], [0], [0], [1], [0, 0, 1, 1], [], []>} : vector<2x128xf32>, vector<128x128xf32>, vector<2x128xf32> -> vector<2x128xf32>
    %c1 = arith.constant 1 : index
    %c0_14 = arith.constant 0 : index
    %14 = vector.load %arg7[%c1, %c0_14] : memref<3x128xf32, #tpu.memory_space<vmem>>, vector<1x128xf32>
    %15 = vector.broadcast %14 : vector<1x128xf32> to vector<2x128xf32>
    %16 = arith.addf %13, %15 : vector<2x128xf32>
    %cst_15 = arith.constant 0.000000e+00 : f32
    %17 = vector.broadcast %cst_15 : f32 to vector<2x128xf32>
    %18 = arith.maximumf %16, %17 : vector<2x128xf32>
    %c0_16 = arith.constant 0 : index
    %c0_17 = arith.constant 0 : index
    %19 = vector.load %arg6[%c0_16, %c0_17] : memref<128x128xf32, #tpu.memory_space<vmem>>, vector<128x128xf32>
    %cst_18 = arith.constant dense<0.000000e+00> : vector<2x128xf32>
    %20 = tpu.matmul %18, %19, %cst_18 {dimension_numbers = #tpu.dot_dimension_numbers<[1], [0], [0], [1], [0, 0, 1, 1], [], []>} : vector<2x128xf32>, vector<128x128xf32>, vector<2x128xf32> -> vector<2x128xf32>
    %c2 = arith.constant 2 : index
    %c0_19 = arith.constant 0 : index
    %21 = vector.load %arg7[%c2, %c0_19] : memref<3x128xf32, #tpu.memory_space<vmem>>, vector<1x128xf32>
    %22 = vector.broadcast %21 : vector<1x128xf32> to vector<2x128xf32>
    %23 = arith.addf %20, %22 : vector<2x128xf32>
    %c0_20 = arith.constant 0 : index
    %c0_21 = arith.constant 0 : index
    %24 = vector.load %arg8[%c0_20, %c0_21] : memref<2x128xf32, #tpu.memory_space<vmem>>, vector<2x128xf32>
    tpu.vector_store %arg8[%c0_20, %c0_21], %23 {strides = array<i32>} : memref<2x128xf32, #tpu.memory_space<vmem>>, vector<2x128xf32>,
    return
  }
  func.func @transform_0(%arg0: i32) -> (i32, i32) {
    %c0_i32 = arith.constant 0 : i32
    %c0_i32_0 = arith.constant 0 : i32
    return %arg0, %c0_i32 : i32, i32
  }
  func.func @transform_1(%arg0: i32) -> (i32, i32) {
    %c0_i32 = arith.constant 0 : i32
    %c0_i32_0 = arith.constant 0 : i32
    return %arg0, %c0_i32 : i32, i32
  }
  func.func @transform_2(%arg0: i32) -> (i32, i32) {
    %c0_i32 = arith.constant 0 : i32
    %c0_i32_0 = arith.constant 0 : i32
    %c0_i32_1 = arith.constant 0 : i32
    return %c0_i32, %c0_i32_0 : i32, i32
  }
  func.func @transform_3(%arg0: i32) -> (i32, i32) {
    %c0_i32 = arith.constant 0 : i32
    %c0_i32_0 = arith.constant 0 : i32
    %c0_i32_1 = arith.constant 0 : i32
    return %c0_i32, %c0_i32_0 : i32, i32
  }
  func.func @transform_4(%arg0: i32) -> (i32, i32) {
    %c0_i32 = arith.constant 0 : i32
    %c0_i32_0 = arith.constant 0 : i32
    %c0_i32_1 = arith.constant 0 : i32
    return %c0_i32, %c0_i32_0 : i32, i32
  }
  func.func @transform_5(%arg0: i32) -> (i32, i32) {
    %c0_i32 = arith.constant 0 : i32
    %c0_i32_0 = arith.constant 0 : i32
    %c0_i32_1 = arith.constant 0 : i32
    return %c0_i32, %c0_i32_0 : i32, i32
  }
  func.func @transform_6(%arg0: i32) -> (i32, i32) {
    %c0_i32 = arith.constant 0 : i32
    %c0_i32_0 = arith.constant 0 : i32
    %c0_i32_1 = arith.constant 0 : i32
    return %c0_i32, %c0_i32_0 : i32, i32
  }
  func.func @transform_7(%arg0: i32) -> (i32, i32) {
    %c0_i32 = arith.constant 0 : i32
    %c0_i32_0 = arith.constant 0 : i32
    return %arg0, %c0_i32 : i32, i32
  }
}

</mosaic_0001>

<bundles_post_ra>
// kernel: tpu_custom_call.1
= control target key start
LH: loop header
LB: loop body
LE: loop exit
PB: predicated region body
PF: predicated region fallthrough
CT: control target
= control target key end

     0   :  { %12 = vsyncpa [#allocation3], 0  ;;  %s894_s0 = inlined_call_operand.hbm [shape: f32[2,16], index: 0, kind: input, shape index: {}]   ;;  %s895_s1 = inlined_call_operand.hbm [shape: f32[2,16], index: 1, kind: input, shape index: {}]   ;;  %s896_s2 = inlined_call_operand.hbm [shape: f32[16,128], index: 2, kind: input, shape index: {}]   ;;  %s897_s3 = inlined_call_operand.hbm [shape: f32[16,128], index: 3, kind: input, shape index: {}]   ;;  %s898_s4 = inlined_call_operand.hbm [shape: f32[128,128], index: 4, kind: input, shape index: {}]   ;;  %s899_s5 = inlined_call_operand.hbm [shape: f32[128,128], index: 5, kind: input, shape index: {}]   ;;  %s900_s6 = inlined_call_operand.vmem [shape: f32[3,128], index: 6, kind: input, shape index: {}]   ;;  %s901_s7 = inlined_call_operand.hbm [shape: f32[2,128], index: 7, kind: output, shape index: {}]  }
   0x1   :  { %13 = vsyncpa [#allocation6], 0 }
   0x2   :  { %14 = vsyncpa [#allocation9], 0 }
   0x3   :  { %15 = vsyncpa [#allocation12], 0 }
   0x4   :  { %16 = vsyncpa [#allocation4], 0  ;;  %s757_s24 = smov [#allocation5]  }
   0x5   :  { %s33_s25 = sshll.u32 %s757_s24, 4  ;;  %s34_s25 = int_to_ptr.vmem [resolvable:$true] %s33_s25 }
   0x6   :  { %s615_s26 = scalar_lea.vmem %s34_s25, 32  ;;  %p620_p1 = scmp.lt.s32.totalorder %s34_s25, %s34_s25 }
   0x7   :  { %p616_p0 = scmp.ne.s32.totalorder %s34_s25, %s615_s26  ;;  %p621_p2 = scmp.lt.s32.totalorder %s615_s26, %s615_s26 }
   0x9   :  { %p622_p3 = por %p621_p2, %p620_p1 }
   0xb   :  { %p623_p4 = pnand %p622_p3, %p616_p0 }
   0xd   :  { %626 = shalt.err (!%p623_p4)
}
   0xe   :  { %36 = dma.hbm_to_vmem [thread:$0]  %s895_s1, 32, %s34_s25, [#allocation6]  }
   0xf   :  { %s758_s29 = smov [#allocation8]   ;;  %s759_s8 = smov [#allocation2]  }
  0x10   :  { %s54_s30 = sshll.u32 %s758_s29, 4  ;;  %s23_s9 = sshll.u32 %s759_s8, 4  ;;  %s55_s30 = int_to_ptr.vmem [resolvable:$true] %s54_s30  ;;  %s24_s9 = int_to_ptr.vmem [resolvable:$true] %s23_s9 }
  0x11   :  { %s635_s10 = scalar_lea.vmem %s55_s30, 256  ;;  %p640_p6 = scmp.lt.s32.totalorder %s55_s30, %s55_s30 }
  0x12   :  { %p636_p5 = scmp.ne.s32.totalorder %s55_s30, %s635_s10  ;;  %p641_p7 = scmp.lt.s32.totalorder %s635_s10, %s635_s10 }
  0x14   :  { %p642_p8 = por %p641_p7, %p640_p6 }
  0x16   :  { %p643_p9 = pnand %p642_p8, %p636_p5 }
  0x18   :  { %646 = shalt.err (!%p643_p9)
}
  0x19   :  { %s760_s11 = smov 128   ;;  %s761_s12 = smov 8  }
  0x1a   :  { %60 = dma.hbm_to_vmem [thread:$0]  %s897_s3, 256, %s55_s30, [#allocation9], %s760_s11, %s760_s11, %s761_s12  }
  0x1b   :  { %s655_s1 = scalar_lea.vmem %s24_s9, 32  ;;  %p660_p11 = scmp.lt.s32.totalorder %s24_s9, %s24_s9 }
  0x1c   :  { %p656_p10 = scmp.ne.s32.totalorder %s24_s9, %s655_s1  ;;  %p661_p12 = scmp.lt.s32.totalorder %s655_s1, %s655_s1 }
  0x1e   :  { %p662_p13 = por %p661_p12, %p660_p11 }
  0x20   :  { %p663_p0 = pnand %p662_p13, %p656_p10 }
  0x22   :  { %666 = shalt.err (!%p663_p0)
}
  0x23   :  { %26 = dma.hbm_to_vmem [thread:$0]  %s894_s0, 32, %s24_s9, [#allocation3]  }
  0x24   :  { %s762_s17 = smov [#allocation7]   ;;  %s763_s19 = smov [#allocation10]  }
  0x25   :  { %s42_s18 = sshll.u32 %s762_s17, 4  ;;  %s66_s20 = sshll.u32 %s763_s19, 4  ;;  %s43_s18 = int_to_ptr.vmem [resolvable:$true] %s42_s18  ;;  %s67_s20 = int_to_ptr.vmem [resolvable:$true] %s66_s20 }
  0x26   :  { %s675_s21 = scalar_lea.vmem %s43_s18, 256  ;;  %p680_p2 = scmp.lt.s32.totalorder %s43_s18, %s43_s18 }
  0x27   :  { %p676_p1 = scmp.ne.s32.totalorder %s43_s18, %s675_s21  ;;  %p681_p3 = scmp.lt.s32.totalorder %s675_s21, %s675_s21 }
  0x29   :  { %p682_p4 = por %p681_p3, %p680_p2 }
  0x2b   :  { %p683_p5 = pnand %p682_p4, %p676_p1 }
  0x2d   :  { %686 = shalt.err (!%p683_p5)
}
  0x2e   :  { %48 = dma.hbm_to_vmem [thread:$0]  %s896_s2, 256, %s43_s18, [#allocation6], %s760_s11, %s760_s11, %s761_s12  }
  0x2f   :  { %s695_s0 = scalar_lea.vmem %s67_s20, 2048  ;;  %p700_p7 = scmp.lt.s32.totalorder %s67_s20, %s67_s20 }
  0x30   :  { %p696_p6 = scmp.ne.s32.totalorder %s67_s20, %s695_s0  ;;  %p701_p8 = scmp.lt.s32.totalorder %s695_s0, %s695_s0 }
  0x32   :  { %p702_p9 = por %p701_p8, %p700_p7 }
  0x34   :  { %p703_p10 = pnand %p702_p9, %p696_p6 }
  0x36   :  { %706 = shalt.err (!%p703_p10)
}
  0x37   :  { %72 = dma.hbm_to_vmem [thread:$0]  %s898_s4, 2048, %s67_s20, [#allocation9], %s760_s11, %s760_s11, %s761_s12  }
  0x38   :  { %s764_s25 = smov [#allocation11]  }
  0x39   :  { %s78_s26 = sshll.u32 %s764_s25, 4  ;;  %s79_s26 = int_to_ptr.vmem [resolvable:$true] %s78_s26 }
  0x3a   :  { %s715_s27 = scalar_lea.vmem %s79_s26, 2048  ;;  %p720_p12 = scmp.lt.s32.totalorder %s79_s26, %s79_s26 }
  0x3b   :  { %p716_p11 = scmp.ne.s32.totalorder %s79_s26, %s715_s27  ;;  %p721_p13 = scmp.lt.s32.totalorder %s715_s27, %s715_s27 }
  0x3d   :  { %p722_p0 = por %p721_p13, %p720_p12 }
  0x3f   :  { %p723_p1 = pnand %p722_p0, %p716_p11 }
  0x41   :  { %726 = shalt.err (!%p723_p1)
}
  0x42   :  { %84 = dma.hbm_to_vmem [thread:$0]  %s899_s5, 2048, %s79_s26, [#allocation12], %s760_s11, %s760_s11, %s761_s12  }
  0x43   :  { %747 = dma.done.wait [#allocation3], 32  }
  0x44   :  { %748 = vsyncadd [#allocation3], 4294967264 }
  0x45   :  { %749 = dma.done.wait [#allocation6], 288  }
  0x46   :  { %750 = vsyncadd [#allocation6], 4294967008 }
  0x47   :  { %751 = dma.done.wait [#allocation9], 2304  }
  0x48   :  { %752 = vsyncadd [#allocation9], 4294964992 }
  0x49   :  { %753 = dma.done.wait [#allocation12], 2048  }
  0x4a   :  { %754 = vsyncadd [#allocation12], 4294965248  ;;  %v765_v0 = vmov 0.0   ;;  %vm766_vm0 = vmmov 0   ;;  %v110_v1 = vld [vmem:[#allocation8 + $0x8] sm:$0xff]  ;;  %v108_v2 = vld [vmem:[#allocation7 + $0x8] sm:$0xff] }
  0x4b   :  { %512 = vmatprep.subr.mxu0 %v765_v0  ;;  %519 = vmatprep.subr.mxu1 %v765_v0  ;;  %v109_v3 = vld [vmem:[#allocation8] sm:$0xff]  ;;  %v107_v4 = vld [vmem:[#allocation7] sm:$0xff]  ;;  %v106_v5 = vld [vmem:[#allocation5] sm:$0x3]  ;;  %vm111_vm1 = vcmask 130048   ;;  %s767_s10 = smov [#allocation13]  }
  0x4c   :  { %516 = vmatprep.mubr.msk.f32.mxu0 %vm766_vm0, %v765_v0  ;;  %523 = vmatprep.mubr.msk.f32.mxu1 %vm766_vm0, %v765_v0  ;;  %v105_v6 = vld [vmem:[#allocation2] sm:$0x3]  ;;  %v279_v8 = vld [vmem:[#allocation10 + $0x70] sm:$0xff]  ;;  %v278_v9 = vld [vmem:[#allocation10 + $0x68] sm:$0xff]  ;;  %s455_s11 = sshll.u32 %s767_s10, 4  ;;  %s456_s11 = int_to_ptr.vmem [resolvable:$true] %s455_s11 }
  0x4d   :  { %513 = vmatpush3.msra.mxu0 %v110_v1  ;;  %520 = vmatpush3.msra.mxu1 %v108_v2  ;;  %v280_v7 = vld [vmem:[#allocation10 + $0x78] sm:$0xff]  ;;  %v277_v10 = vld [vmem:[#allocation10 + $0x60] sm:$0xff]  ;;  %v275_v12 = vld [vmem:[#allocation10 + $0x50] sm:$0xff]  ;;  %s727_s12 = scalar_lea.vmem %s456_s11, 32  ;;  %p732_p3 = scmp.lt.s32.totalorder %s456_s11, %s456_s11 }
  0x4e   :  { %514 = vmatprep.subr.mxu0 %v765_v0  ;;  %521 = vmatprep.subr.mxu1 %v765_v0  ;;  %v276_v11 = vld [vmem:[#allocation10 + $0x58] sm:$0xff]  ;;  %v274_v13 = vld [vmem:[#allocation10 + $0x48] sm:$0xff]  ;;  %v273_v14 = vld [vmem:[#allocation10 + $0x40] sm:$0xff]  ;;  %p728_p2 = scmp.ne.s32.totalorder %s456_s11, %s727_s12  ;;  %p733_p4 = scmp.lt.s32.totalorder %s727_s12, %s727_s12 }
  0x4f   :  { %515 = vmatpush3.msra.mxu0 %v109_v3  ;;  %522 = vmatpush3.msra.mxu1 %v107_v4  ;;  %v272_v15 = vld [vmem:[#allocation10 + $0x38] sm:$0xff]  ;;  %v271_v16 = vld [vmem:[#allocation10 + $0x30] sm:$0xff]  ;;  %v270_v17 = vld [vmem:[#allocation10 + $0x28] sm:$0xff] }
  0x50   :  { %517 = vmatmul.mubr.msk.f32.vlgmr.msra.gmra.mxu0 %vm111_vm1, %v106_v5  ;;  %524 = vmatmul.mubr.msk.f32.vlgmr.msra.gmra.mxu1 %vm111_vm1, %v105_v6  ;;  %v269_v18 = vld [vmem:[#allocation10 + $0x20] sm:$0xff]  ;;  %v268_v19 = vld [vmem:[#allocation10 + $0x18] sm:$0xff]  ;;  %v267_v20 = vld [vmem:[#allocation10 + $0x10] sm:$0xff]  ;;  %p734_p5 = por %p733_p4, %p732_p3 }
  0x51   :  { %526 = vmatprep.subr.mxu0 %v765_v0  ;;  %558 = vmatprep.mubr.msk.f32.mxu0 %vm766_vm0, %v765_v0  ;;  %v266_v21 = vld [vmem:[#allocation10 + $0x8] sm:$0xff]  ;;  %v265_v22 = vld [vmem:[#allocation10] sm:$0xff]  ;;  %v372_v23 = vld [vmem:[#allocation11 + $0x78] sm:$0xff] }
  0x52   :  { %527 = vmatpush3.msra.mxu0 %v280_v7  ;;  %561 = vmatprep.subr.mxu1 %v765_v0  ;;  %v371_v24 = vld [vmem:[#allocation11 + $0x70] sm:$0xff]  ;;  %v370_v25 = vld [vmem:[#allocation11 + $0x68] sm:$0xff]  ;;  %v369_v26 = vld [vmem:[#allocation11 + $0x60] sm:$0xff]  ;;  %p735_p6 = pnand %p734_p5, %p728_p2 }
  0x53   :  { %528 = vmatprep.subr.mxu0 %v765_v0  ;;  %593 = vmatprep.mubr.msk.f32.mxu1 %vm766_vm0, %v765_v0  ;;  %v368_v27 = vld [vmem:[#allocation11 + $0x58] sm:$0xff]  ;;  %v367_v28 = vld [vmem:[#allocation11 + $0x50] sm:$0xff]  ;;  %v366_v29 = vld [vmem:[#allocation11 + $0x48] sm:$0xff] }
  0x54   :  { %529 = vmatpush3.msra.mxu0 %v279_v8  ;;  %562 = vmatpush3.msra.mxu1 %v372_v23  ;;  %v365_v30 = vld [vmem:[#allocation11 + $0x40] sm:$0xff]  ;;  %v364_v31 = vld [vmem:[#allocation11 + $0x38] sm:$0xff]  ;;  %v363_v32 = vld [vmem:[#allocation11 + $0x30] sm:$0xff] }
  0x55   :  { %530 = vmatprep.subr.mxu0 %v765_v0  ;;  %563 = vmatprep.subr.mxu1 %v765_v0  ;;  %v362_v33 = vld [vmem:[#allocation11 + $0x28] sm:$0xff]  ;;  %v361_v34 = vld [vmem:[#allocation11 + $0x20] sm:$0xff]  ;;  %v360_v35 = vld [vmem:[#allocation11 + $0x18] sm:$0xff] }
  0x56   :  { %531 = vmatpush3.msra.mxu0 %v278_v9  ;;  %564 = vmatpush3.msra.mxu1 %v371_v24  ;;  %v469_v38 = vld [vmem:[%s900_s6] ss:$0 sm:$0xff]  ;;  %v359_v44 = vld [vmem:[#allocation11 + $0x10] sm:$0xff]  ;;  %v358_v45 = vld [vmem:[#allocation11 + $0x8] sm:$0xff] }
  0x57   :  { %532 = vmatprep.subr.mxu0 %v765_v0  ;;  %565 = vmatprep.subr.mxu1 %v765_v0  ;;  %v357_v46 = vld [vmem:[#allocation11] sm:$0xff]  ;;  %v470_v47 = vld [vmem:[%s900_s6 + $0x1] ss:$0 sm:$0xff]  ;;  %v471_v52 = vld [vmem:[%s900_s6 + $0x2] ss:$0 sm:$0xff] }
  0x58   :  { %533 = vmatpush3.msra.mxu0 %v277_v10  ;;  %566 = vmatpush3.msra.mxu1 %v370_v25 }
  0x59   :  { %534 = vmatprep.subr.mxu0 %v765_v0  ;;  %567 = vmatprep.subr.mxu1 %v765_v0 }
  0x5a   :  { %535 = vmatpush3.msra.mxu0 %v276_v11  ;;  %568 = vmatpush3.msra.mxu1 %v369_v26 }
  0x5b   :  { %536 = vmatprep.subr.mxu0 %v765_v0  ;;  %569 = vmatprep.subr.mxu1 %v765_v0 }
  0x5c   :  { %537 = vmatpush3.msra.mxu0 %v275_v12  ;;  %570 = vmatpush3.msra.mxu1 %v368_v27 }
  0x5d   :  { %538 = vmatprep.subr.mxu0 %v765_v0  ;;  %571 = vmatprep.subr.mxu1 %v765_v0 }
  0x5e   :  { %539 = vmatpush3.msra.mxu0 %v274_v13  ;;  %572 = vmatpush3.msra.mxu1 %v367_v28 }
  0x5f   :  { %540 = vmatprep.subr.mxu0 %v765_v0  ;;  %573 = vmatprep.subr.mxu1 %v765_v0 }
  0x60   :  { %541 = vmatpush3.msra.mxu0 %v273_v14  ;;  %574 = vmatpush3.msra.mxu1 %v366_v29 }
  0x61   :  { %542 = vmatprep.subr.mxu0 %v765_v0  ;;  %575 = vmatprep.subr.mxu1 %v765_v0 }
  0x62   :  { %543 = vmatpush3.msra.mxu0 %v272_v15  ;;  %576 = vmatpush3.msra.mxu1 %v365_v30 }
  0x63   :  { %544 = vmatprep.subr.mxu0 %v765_v0  ;;  %577 = vmatprep.subr.mxu1 %v765_v0 }
  0x64   :  { %545 = vmatpush3.msra.mxu0 %v271_v16  ;;  %578 = vmatpush3.msra.mxu1 %v364_v31 }
  0x65   :  { %546 = vmatprep.subr.mxu0 %v765_v0  ;;  %579 = vmatprep.subr.mxu1 %v765_v0 }
  0x66   :  { %547 = vmatpush3.msra.mxu0 %v270_v17  ;;  %580 = vmatpush3.msra.mxu1 %v363_v32 }
  0x67   :  { %548 = vmatprep.subr.mxu0 %v765_v0  ;;  %581 = vmatprep.subr.mxu1 %v765_v0 }
  0x68   :  { %549 = vmatpush3.msra.mxu0 %v269_v18  ;;  %582 = vmatpush3.msra.mxu1 %v362_v33 }
  0x69   :  { %550 = vmatprep.subr.mxu0 %v765_v0  ;;  %583 = vmatprep.subr.mxu1 %v765_v0 }
  0x6a   :  { %551 = vmatpush3.msra.mxu0 %v268_v19  ;;  %584 = vmatpush3.msra.mxu1 %v361_v34 }
  0x6b   :  { %552 = vmatprep.subr.mxu0 %v765_v0  ;;  %585 = vmatprep.subr.mxu1 %v765_v0 }
  0x6c   :  { %553 = vmatpush3.msra.mxu0 %v267_v20  ;;  %586 = vmatpush3.msra.mxu1 %v360_v35 }
  0x6d   :  { %554 = vmatprep.subr.mxu0 %v765_v0  ;;  %587 = vmatprep.subr.mxu1 %v765_v0 }
  0x6e   :  { %555 = vmatpush3.msra.mxu0 %v266_v21  ;;  %588 = vmatpush3.msra.mxu1 %v359_v44 }
  0x6f   :  { %556 = vmatprep.subr.mxu0 %v765_v0  ;;  %589 = vmatprep.subr.mxu1 %v765_v0 }
  0x70   :  { %557 = vmatpush3.msra.mxu0 %v265_v22  ;;  %590 = vmatpush3.msra.mxu1 %v358_v45 }
  0x71   :  { %591 = vmatprep.subr.mxu1 %v765_v0 }
  0x72   :  { %592 = vmatpush3.msra.mxu1 %v357_v46 }
 0x110   :  { %v181_v36 = vpop.f32.mrf.mxu0  ;;  %v254_v37 = vpop.f32.mrf.mxu1 }
 0x111   :  { %v255_v39 = vadd.f32 %v254_v37, %v181_v36 }
 0x112   :  { %v518_v40 = vpop.f32.mrf.mxu0  ;;  %v525_v41 = vpop.f32.mrf.mxu1 }
 0x113   :  { %v263_v42 = vadd.f32 %v469_v38, %v255_v39 }
 0x115   :  { %v264_v43 = vmax.f32 %v263_v42, 0.0 }
 0x117   :  { %559 = vmatmul.mubr.f32.vlgmr.msra.gmra.mxu0 %v264_v43 }
 0x1d7   :  { %v352_v48 = vpop.f32.mrf.mxu0 }
 0x1d8   :  { %v353_v49 = vadd.f32 %v470_v47, %v352_v48 }
 0x1d9   :  { %v560_v50 = vpop.f32.mrf.mxu0 }
 0x1da   :  { %v356_v51 = vmax.f32 %v353_v49, 0.0 }
 0x1dc   :  { %594 = vmatmul.mubr.f32.vlgmr.msra.gmra.mxu1 %v356_v51 }
 0x29c   :  { %v444_v53 = vpop.f32.mrf.mxu1 }
 0x29d   :  { %v445_v54 = vadd.f32 %v471_v52, %v444_v53 }
 0x29e   :  { %v595_v55 = vpop.f32.mrf.mxu1 }
 0x29f   :  { %448 = vst [vmem:[#allocation13] sm:$0x3] %v445_v54 }
 0x2a0   :  { %738 = shalt.err (!%p735_p6)
}
 0x2a1   :  { %458 = dma.vmem_to_hbm [thread:$0]  %s456_s11, 32, %s901_s7, [#allocation4]  }
 0x2a2   :  { %755 = dma.done.wait [#allocation4], 32  }
 0x2a3   :  { %756 = vsyncadd [#allocation4], 4294967264 }
 0x2a4   :  { %462 = vsyncpa [#allocation3], 1 }
 0x2a5   :  { %463 = vsyncpa [#allocation6], 1 }
 0x2a6   :  { %464 = vsyncpa [#allocation9], 1 }
 0x2a7   :  { %465 = vsyncpa [#allocation12], 1 }
 0x2a8   :  { %466 = vsyncpa [#allocation4], 1 }

</bundles_post_ra>
